<compile_context>
chip_gen: v7x
topology: tpu7x:2x2x1
jax: 0.10.0
libtpu: 0.0.40
codegen_flags: <defaults>
</compile_context>

<pallas_src>
import jax
import jax.numpy as jnp
from jax import lax
from jax.experimental import pallas as pl
from jax.experimental.pallas import tpu as pltpu


# ---------------- fused Pallas kernel --------------------------------------


def _upconv_block_kernel(dec_ref, enc_ref, wup_ref, bup_ref, w1_ref, b1_ref,
                         w2_ref, b2_ref, o_ref, xpad):
    """Fused UpConv forward for one batch element (all activations stay in VMEM).

    dec_ref: (1, Hd, Wd*Cin)        decoder feature, lane-dense slab (bf16/f32)
    enc_ref: (1, He, We*Cout)       encoder skip, lane-dense slab (He=2Hd, We=2Wd)
    wup_ref: (Wd*Cin, 2*We*Cout)    block-diag transpose-conv weight,
                                    columns [even-rows half | odd-rows half], (j,b,d)
    bup_ref: (1, We*Cout)           transpose-conv bias tiled to lane order (w, d), f32
    w1_ref : (3, 2*We*Cout, We*Cout) banded conv1 weight per dy; rows [updec | enc]
    b1_ref : (1, We*Cout)           f32
    w2_ref : (3, We*Cout, We*Cout)  banded conv2 weight per dy
    b2_ref : (1, We*Cout)           f32
    o_ref  : (1, He, We*Cout)       output slab, f32
    xpad   : (He+2, 2*We*Cout)      f32 scratch; left half = padded updec / y1,
                                    right half = padded enc (row halo only)
    """
    hd = dec_ref.shape[1]
    he = 2 * hd
    lo = o_ref.shape[-1]
    cdt = wup_ref.dtype                      # MXU feed dtype (bf16 or f32)

    # Zero ONLY the two halo rows, every grid step (do NOT gate on program_id:
    # under megacore each core runs a disjoint subset of b).  Interior rows are
    # fully overwritten below; horizontal padding lives inside the banded weights.
    zrow = jnp.zeros((1, xpad.shape[1]), xpad.dtype)
    xpad[0:1, :] = zrow
    xpad[he + 1:he + 2, :] = zrow

    # --- ConvTranspose2d(k=2, s=2) + bias + ReLU: one block-diagonal matmul ----
    # Column packing: [a=0 half | a=1 half], each half ordered (j, b, d) == the lane
    # order of a (He, We*Cout) slab row, so the 2x2 interleave is a pure reshape.
    up = jnp.dot(dec_ref[0], wup_ref[...],
                 preferred_element_type=jnp.float32)            # (Hd, 2*lo)
    updec = jnp.maximum(up.reshape(he, lo) + bup_ref[...], 0.0)  # norm0=Id, act0=ReLU

    # mrg = concat([updec, enc], channel): the two halves sit at lane-tile-aligned
    # offsets 0 and 128 of one row-padded scratch; the concat is folded into w1 rows.
    xpad[1:he + 1, 0:lo] = updec.astype(xpad.dtype)
    xpad[1:he + 1, lo:2 * lo] = enc_ref[0].astype(xpad.dtype)    # DummyAttention: genc = enc

    # --- conv1 (3x3 'same' on mrg) + bias + ReLU: 3 banded matmuls (one per dy) ---
    y1 = (jnp.dot(xpad[0:he, :].astype(cdt), w1_ref[0],
                  preferred_element_type=jnp.float32)
          + jnp.dot(xpad[1:he + 1, :].astype(cdt), w1_ref[1],
                    preferred_element_type=jnp.float32)
          + jnp.dot(xpad[2:he + 2, :].astype(cdt), w1_ref[2],
                    preferred_element_type=jnp.float32))
    y1 = jnp.maximum(y1 + b1_ref[...], 0.0)                      # (He, lo), f32

    # Reuse the left half of the scratch for padded y1 (its halo rows are still zero).
    xpad[1:he + 1, 0:lo] = y1.astype(xpad.dtype)

    # --- conv2 (3x3 'same') + bias + ReLU ---------------------------------------
    y2 = (jnp.dot(xpad[0:he, 0:lo].astype(cdt), w2_ref[0],
                  preferred_element_type=jnp.float32)
          + jnp.dot(xpad[1:he + 1, 0:lo].astype(cdt), w2_ref[1],
                    preferred_element_type=jnp.float32)
          + jnp.dot(xpad[2:he + 2, 0:lo].astype(cdt), w2_ref[2],
                    preferred_element_type=jnp.float32))
    y2 = jnp.maximum(y2 + b2_ref[...], 0.0)
    o_ref[0] = y2.astype(o_ref.dtype)        # dense (He, We*Cout) store


# ---------------- wrapper ---------------------------------------------------


def upconv_forward(enc_nchw, dec_nchw, params, *, compute_dtype=jnp.bfloat16):
    n, cin, hd, wd = dec_nchw.shape
    _, cout, he, we = enc_nchw.shape
    # autocrop is a no-op for matching shapes (the only case implemented here).
    assert (he, we) == (2 * hd, 2 * wd)
    lde = wd * cin          # dec slab lane width   (128 in the test config)
    lo = we * cout          # enc/updec/out lane width (128 in the test config)

    # NCHW -> lane-dense (H, W*C) slabs.  Reshapes are free; the two transposes exist
    # only because the public interface is NCHW like PyTorch.
    # TODO(synk): keep the surrounding network NHWC to drop these transposes.
    dec_slab = jnp.transpose(dec_nchw, (0, 2, 3, 1)).reshape(n, hd, lde).astype(compute_dtype)
    enc_slab = jnp.transpose(enc_nchw, (0, 2, 3, 1)).reshape(n, he, lo).astype(compute_dtype)

    w_up, b_up = params["w_up"], params["b_up"]      # (2,2,Cin,Cout), (1,Cout)
    w1, b1 = params["w1"], params["b1"]              # (3,3,2*Cout,Cout), (1,Cout)
    w2, b2 = params["w2"], params["b2"]              # (3,3,Cout,Cout), (1,Cout)

    # ---- transpose-conv weight as a block-diagonal (Wd*Cin, 2*We*Cout) matrix ----
    def _updiag(a):
        blk = jnp.transpose(w_up[a], (1, 0, 2)).reshape(cin, 2 * cout)   # (c, (b,d))
        return jnp.kron(jnp.eye(wd, dtype=w_up.dtype), blk)              # (Wd*Cin, Wd*2*Cout)

    wup_bd = jnp.concatenate([_updiag(0), _updiag(1)], axis=1).astype(compute_dtype)

    # ---- banded 3x3 conv weights: per dy a (We*Ci, We*Co) matrix whose band encodes
    # the dx taps AND the horizontal 'same' zero-padding ----
    def _banded(w3):                                  # (3, 3, Ci, Co)
        mats = []
        for dy in range(3):
            m = sum(jnp.kron(jnp.eye(we, k=1 - dx, dtype=w3.dtype), w3[dy, dx])
                    for dx in range(3))
            mats.append(m)
        return jnp.stack(mats)                        # (3, We*Ci, We*Co)

    w1_bd = jnp.concatenate([_banded(w1[:, :, :cout, :]),     # updec half (rows 0:lo)
                             _banded(w1[:, :, cout:, :])],    # enc half  (rows lo:2lo)
                            axis=1).astype(compute_dtype)      # (3, 2*lo, lo)
    w2_bd = _banded(w2).astype(compute_dtype)                  # (3, lo, lo)

    bup_slab = jnp.tile(b_up.astype(jnp.float32), (1, we))     # (1, lo), lane order (w, d)
    b1_slab = jnp.tile(b1.astype(jnp.float32), (1, we))
    b2_slab = jnp.tile(b2.astype(jnp.float32), (1, we))

    out = pl.pallas_call(
        _upconv_block_kernel,
        out_shape=jax.ShapeDtypeStruct((n, he, lo), jnp.float32),
        grid_spec=pltpu.PrefetchScalarGridSpec(
            num_scalar_prefetch=0,
            # TODO(synk): for large feature maps add an He row-tile axis (1-row halo)
            # and/or pack several images per step; one image per step fits here.
            grid=(n,),
            in_specs=[
                pl.BlockSpec((1, hd, lde), lambda b: (b, 0, 0)),       # dec slab
                pl.BlockSpec((1, he, lo), lambda b: (b, 0, 0)),        # enc slab
                pl.BlockSpec((lde, 2 * lo), lambda b: (0, 0)),         # wup block-diag
                pl.BlockSpec((1, lo), lambda b: (0, 0)),               # bup (tiled)
                pl.BlockSpec((3, 2 * lo, lo), lambda b: (0, 0, 0)),    # w1 banded
                pl.BlockSpec((1, lo), lambda b: (0, 0)),               # b1 (tiled)
                pl.BlockSpec((3, lo, lo), lambda b: (0, 0, 0)),        # w2 banded
                pl.BlockSpec((1, lo), lambda b: (0, 0)),               # b2 (tiled)
            ],
            out_specs=pl.BlockSpec((1, he, lo), lambda b: (b, 0, 0)),
            scratch_shapes=[
                pltpu.VMEM((he + 2, 2 * lo), jnp.float32),   # row-padded [updec|enc] / y1
            ],
        ),
        compiler_params=pltpu.CompilerParams(
            dimension_semantics=("parallel",),               # batch axis -> both TCs
            vmem_limit_bytes=32 * 1024 * 1024,
        ),
    )(dec_slab, enc_slab, wup_bd, bup_slab, w1_bd, b1_slab, w2_bd, b2_slab)

    y = out.reshape(n, he, we, cout)
    return jnp.transpose(y, (0, 3, 1, 2))                    # NHWC -> NCHW


# ---------------- pure-JAX reference (for correctness check) ----------------


def upconv_ref(enc_nchw, dec_nchw, params):
    enc = jnp.transpose(enc_nchw, (0, 2, 3, 1))
    dec = jnp.transpose(dec_nchw, (0, 2, 3, 1))
    up = jnp.einsum("nijc,abcd->niajbd", dec, params["w_up"])
    n, hd, _, wd, _, cout = up.shape
    up = up.reshape(n, 2 * hd, 2 * wd, cout) + params["b_up"][0]
    updec = jax.nn.relu(up)
    mrg = jnp.concatenate([updec, enc], axis=-1)
    dn = ("NHWC", "HWIO", "NHWC")
    y = lax.conv_general_dilated(mrg, params["w1"], (1, 1), ((1, 1), (1, 1)),
                                 dimension_numbers=dn) + params["b1"][0]
    y = jax.nn.relu(y)
    y = lax.conv_general_dilated(y, params["w2"], (1, 1), ((1, 1), (1, 1)),
                                 dimension_numbers=dn) + params["b2"][0]
    y = jax.nn.relu(y)
    return jnp.transpose(y, (0, 3, 1, 2))


if __name__ == "__main__":
    key = jax.random.PRNGKey(0)
    in_ch, out_ch = 8, 4
    N, Hd, Wd = 2, 16, 16                     # chosen so Wd*Cin = We*Cout = 128 (lane-dense)
    He, We = 2 * Hd, 2 * Wd
    ks = jax.random.split(key, 8)

    dec = jax.random.normal(ks[0], (N, in_ch, Hd, Wd), jnp.float32)   # decoder feature
    enc = jax.random.normal(ks[1], (N, out_ch, He, We), jnp.float32)  # encoder skip

    params = dict(
        w_up=0.1 * jax.random.normal(ks[2], (2, 2, in_ch, out_ch), jnp.float32),
        b_up=0.1 * jax.random.normal(ks[3], (1, out_ch), jnp.float32),
        w1=0.1 * jax.random.normal(ks[4], (3, 3, 2 * out_ch, out_ch), jnp.float32),
        b1=0.1 * jax.random.normal(ks[5], (1, out_ch), jnp.float32),
        w2=0.1 * jax.random.normal(ks[6], (3, 3, out_ch, out_ch), jnp.float32),
        b2=0.1 * jax.random.normal(ks[7], (1, out_ch), jnp.float32),
    )

    ref = upconv_ref(enc, dec, params)

    # f32 MXU feeds: exact-semantics check (tight tolerance).
    out_f32 = jax.jit(
        lambda e, d, p: upconv_forward(e, d, p, compute_dtype=jnp.float32)
    )(enc, dec, params)
    jax.block_until_ready(out_f32)
    assert out_f32.shape == (N, out_ch, He, We), out_f32.shape
    assert jnp.allclose(out_f32, ref, atol=2e-4, rtol=2e-4), \
        float(jnp.abs(out_f32 - ref).max())

    # bf16 MXU feeds (default, recommended on v5e/v6e/v7x): looser tolerance.
    out_bf16 = jax.jit(upconv_forward)(enc, dec, params)
    jax.block_until_ready(out_bf16)
    assert out_bf16.shape == (N, out_ch, He, We), out_bf16.shape
    assert jnp.allclose(out_bf16, ref, atol=5e-2, rtol=5e-2), \
        float(jnp.abs(out_bf16 - ref).max())

    print("KERNEL_OK")
</pallas_src>

<mosaic_0001>
module attributes {stable_mosaic.version = 11 : i64} {
  func.func @_upconv_block_kernel(%arg0: i32, %arg1: memref<1x16x128xf32, #tpu.memory_space<vmem>>, %arg2: memref<1x32x128xf32, #tpu.memory_space<vmem>>, %arg3: memref<128x256xf32, #tpu.memory_space<vmem>>, %arg4: memref<1x128xf32, #tpu.memory_space<vmem>>, %arg5: memref<3x256x128xf32, #tpu.memory_space<vmem>>, %arg6: memref<1x128xf32, #tpu.memory_space<vmem>>, %arg7: memref<3x128x128xf32, #tpu.memory_space<vmem>>, %arg8: memref<1x128xf32, #tpu.memory_space<vmem>>, %arg9: memref<1x32x128xf32, #tpu.memory_space<vmem>>, %arg10: memref<34x256xf32, #tpu.memory_space<vmem>>) attributes {dimension_semantics = [#tpu.dimension_semantics<parallel>], iteration_bounds = array<i64: 2>, scalar_prefetch = 0 : i64, scratch_operands = 1 : i64, tpu.core_type = #tpu.core_type<tc>, window_params = [{transform_indices = @transform_0, window_bounds = array<i64: 1, 16, 128>}, {transform_indices = @transform_1, window_bounds = array<i64: 1, 32, 128>}, {pipeline_mode = #tpu.pipeline_mode<synchronous>, transform_indices = @transform_2, window_bounds = array<i64: 128, 256>}, {pipeline_mode = #tpu.pipeline_mode<synchronous>, transform_indices = @transform_3, window_bounds = array<i64: 1, 128>}, {pipeline_mode = #tpu.pipeline_mode<synchronous>, transform_indices = @transform_4, window_bounds = array<i64: 3, 256, 128>}, {pipeline_mode = #tpu.pipeline_mode<synchronous>, transform_indices = @transform_5, window_bounds = array<i64: 1, 128>}, {pipeline_mode = #tpu.pipeline_mode<synchronous>, transform_indices = @transform_6, window_bounds = array<i64: 3, 128, 128>}, {pipeline_mode = #tpu.pipeline_mode<synchronous>, transform_indices = @transform_7, window_bounds = array<i64: 1, 128>}, {transform_indices = @transform_8, window_bounds = array<i64: 1, 32, 128>}]} {
    %cst = arith.constant 0.000000e+00 : f32
    %0 = vector.broadcast %cst : f32 to vector<1x256xf32>
    %c0 = arith.constant 0 : index
    %c0_0 = arith.constant 0 : index
    %1 = vector.load %arg10[%c0, %c0_0] : memref<34x256xf32, #tpu.memory_space<vmem>>, vector<1x256xf32>
    tpu.vector_store %arg10[%c0, %c0_0], %0 {strides = array<i32>} : memref<34x256xf32, #tpu.memory_space<vmem>>, vector<1x256xf32>,
    %c33 = arith.constant 33 : index
    %c0_1 = arith.constant 0 : index
    %2 = vector.load %arg10[%c33, %c0_1] : memref<34x256xf32, #tpu.memory_space<vmem>>, vector<1x256xf32>
    tpu.vector_store %arg10[%c33, %c0_1], %0 {strides = array<i32>} : memref<34x256xf32, #tpu.memory_space<vmem>>, vector<1x256xf32>,
    %c0_2 = arith.constant 0 : index
    %c0_3 = arith.constant 0 : index
    %c0_4 = arith.constant 0 : index
    %3 = vector.load %arg1[%c0_2, %c0_3, %c0_4] : memref<1x16x128xf32, #tpu.memory_space<vmem>>, vector<1x16x128xf32>
    %4 = vector.shape_cast %3 : vector<1x16x128xf32> to vector<16x128xf32>
    %c0_5 = arith.constant 0 : index
    %c0_6 = arith.constant 0 : index
    %5 = vector.load %arg3[%c0_5, %c0_6] : memref<128x256xf32, #tpu.memory_space<vmem>>, vector<128x256xf32>
    %cst_7 = arith.constant dense<0.000000e+00> : vector<16x256xf32>
    %6 = tpu.matmul %4, %5, %cst_7 {dimension_numbers = #tpu.dot_dimension_numbers<[1], [0], [0], [1], [0, 0, 1, 1], [], []>} : vector<16x128xf32>, vector<128x256xf32>, vector<16x256xf32> -> vector<16x256xf32>
    %7 = vector.shape_cast %6 : vector<16x256xf32> to vector<32x128xf32>
    %c0_8 = arith.constant 0 : index
    %c0_9 = arith.constant 0 : index
    %8 = vector.load %arg4[%c0_8, %c0_9] : memref<1x128xf32, #tpu.memory_space<vmem>>, vector<1x128xf32>
    %9 = vector.broadcast %8 : vector<1x128xf32> to vector<32x128xf32>
    %10 = arith.addf %7, %9 : vector<32x128xf32>
    %cst_10 = arith.constant 0.000000e+00 : f32
    %11 = vector.broadcast %cst_10 : f32 to vector<32x128xf32>
    %12 = arith.maximumf %10, %11 : vector<32x128xf32>
    %c1 = arith.constant 1 : index
    %c0_11 = arith.constant 0 : index
    %13 = vector.load %arg10[%c1, %c0_11] : memref<34x256xf32, #tpu.memory_space<vmem>>, vector<32x128xf32>
    tpu.vector_store %arg10[%c1, %c0_11], %12 {strides = array<i32>} : memref<34x256xf32, #tpu.memory_space<vmem>>, vector<32x128xf32>,
    %c0_12 = arith.constant 0 : index
    %c0_13 = arith.constant 0 : index
    %c0_14 = arith.constant 0 : index
    %14 = vector.load %arg2[%c0_12, %c0_13, %c0_14] : memref<1x32x128xf32, #tpu.memory_space<vmem>>, vector<1x32x128xf32>
    %15 = vector.shape_cast %14 : vector<1x32x128xf32> to vector<32x128xf32>
    %c1_15 = arith.constant 1 : index
    %c128 = arith.constant 128 : index
    %16 = vector.load %arg10[%c1_15, %c128] : memref<34x256xf32, #tpu.memory_space<vmem>>, vector<32x128xf32>
    tpu.vector_store %arg10[%c1_15, %c128], %15 {strides = array<i32>} : memref<34x256xf32, #tpu.memory_space<vmem>>, vector<32x128xf32>,
    %c0_16 = arith.constant 0 : index
    %c0_17 = arith.constant 0 : index
    %17 = vector.load %arg10[%c0_16, %c0_17] : memref<34x256xf32, #tpu.memory_space<vmem>>, vector<32x256xf32>
    %c0_18 = arith.constant 0 : index
    %c0_19 = arith.constant 0 : index
    %c0_20 = arith.constant 0 : index
    %18 = vector.load %arg5[%c0_18, %c0_19, %c0_20] : memref<3x256x128xf32, #tpu.memory_space<vmem>>, vector<1x256x128xf32>
    %19 = vector.shape_cast %18 : vector<1x256x128xf32> to vector<256x128xf32>
    %cst_21 = arith.constant dense<0.000000e+00> : vector<32x128xf32>
    %20 = tpu.matmul %17, %19, %cst_21 {dimension_numbers = #tpu.dot_dimension_numbers<[1], [0], [0], [1], [0, 0, 1, 1], [], []>} : vector<32x256xf32>, vector<256x128xf32>, vector<32x128xf32> -> vector<32x128xf32>
    %c1_22 = arith.constant 1 : index
    %c0_23 = arith.constant 0 : index
    %21 = vector.load %arg10[%c1_22, %c0_23] : memref<34x256xf32, #tpu.memory_space<vmem>>, vector<32x256xf32>
    %c1_24 = arith.constant 1 : index
    %c0_25 = arith.constant 0 : index
    %c0_26 = arith.constant 0 : index
    %22 = vector.load %arg5[%c1_24, %c0_25, %c0_26] : memref<3x256x128xf32, #tpu.memory_space<vmem>>, vector<1x256x128xf32>
    %23 = vector.shape_cast %22 : vector<1x256x128xf32> to vector<256x128xf32>
    %cst_27 = arith.constant dense<0.000000e+00> : vector<32x128xf32>
    %24 = tpu.matmul %21, %23, %cst_27 {dimension_numbers = #tpu.dot_dimension_numbers<[1], [0], [0], [1], [0, 0, 1, 1], [], []>} : vector<32x256xf32>, vector<256x128xf32>, vector<32x128xf32> -> vector<32x128xf32>
    %25 = arith.addf %20, %24 : vector<32x128xf32>
    %c2 = arith.constant 2 : index
    %c0_28 = arith.constant 0 : index
    %26 = vector.load %arg10[%c2, %c0_28] : memref<34x256xf32, #tpu.memory_space<vmem>>, vector<32x256xf32>
    %c2_29 = arith.constant 2 : index
    %c0_30 = arith.constant 0 : index
    %c0_31 = arith.constant 0 : index
    %27 = vector.load %arg5[%c2_29, %c0_30, %c0_31] : memref<3x256x128xf32, #tpu.memory_space<vmem>>, vector<1x256x128xf32>
    %28 = vector.shape_cast %27 : vector<1x256x128xf32> to vector<256x128xf32>
    %cst_32 = arith.constant dense<0.000000e+00> : vector<32x128xf32>
    %29 = tpu.matmul %26, %28, %cst_32 {dimension_numbers = #tpu.dot_dimension_numbers<[1], [0], [0], [1], [0, 0, 1, 1], [], []>} : vector<32x256xf32>, vector<256x128xf32>, vector<32x128xf32> -> vector<32x128xf32>
    %30 = arith.addf %25, %29 : vector<32x128xf32>
    %c0_33 = arith.constant 0 : index
    %c0_34 = arith.constant 0 : index
    %31 = vector.load %arg6[%c0_33, %c0_34] : memref<1x128xf32, #tpu.memory_space<vmem>>, vector<1x128xf32>
    %32 = vector.broadcast %31 : vector<1x128xf32> to vector<32x128xf32>
    %33 = arith.addf %30, %32 : vector<32x128xf32>
    %cst_35 = arith.constant 0.000000e+00 : f32
    %34 = vector.broadcast %cst_35 : f32 to vector<32x128xf32>
    %35 = arith.maximumf %33, %34 : vector<32x128xf32>
    %c1_36 = arith.constant 1 : index
    %c0_37 = arith.constant 0 : index
    %36 = vector.load %arg10[%c1_36, %c0_37] : memref<34x256xf32, #tpu.memory_space<vmem>>, vector<32x128xf32>
    tpu.vector_store %arg10[%c1_36, %c0_37], %35 {strides = array<i32>} : memref<34x256xf32, #tpu.memory_space<vmem>>, vector<32x128xf32>,
    %c0_38 = arith.constant 0 : index
    %c0_39 = arith.constant 0 : index
    %37 = vector.load %arg10[%c0_38, %c0_39] : memref<34x256xf32, #tpu.memory_space<vmem>>, vector<32x128xf32>
    %c0_40 = arith.constant 0 : index
    %c0_41 = arith.constant 0 : index
    %c0_42 = arith.constant 0 : index
    %38 = vector.load %arg7[%c0_40, %c0_41, %c0_42] : memref<3x128x128xf32, #tpu.memory_space<vmem>>, vector<1x128x128xf32>
    %39 = vector.shape_cast %38 : vector<1x128x128xf32> to vector<128x128xf32>
    %cst_43 = arith.constant dense<0.000000e+00> : vector<32x128xf32>
    %40 = tpu.matmul %37, %39, %cst_43 {dimension_numbers = #tpu.dot_dimension_numbers<[1], [0], [0], [1], [0, 0, 1, 1], [], []>} : vector<32x128xf32>, vector<128x128xf32>, vector<32x128xf32> -> vector<32x128xf32>
    %c1_44 = arith.constant 1 : index
    %c0_45 = arith.constant 0 : index
    %41 = vector.load %arg10[%c1_44, %c0_45] : memref<34x256xf32, #tpu.memory_space<vmem>>, vector<32x128xf32>
    %c1_46 = arith.constant 1 : index
    %c0_47 = arith.constant 0 : index
    %c0_48 = arith.constant 0 : index
    %42 = vector.load %arg7[%c1_46, %c0_47, %c0_48] : memref<3x128x128xf32, #tpu.memory_space<vmem>>, vector<1x128x128xf32>
    %43 = vector.shape_cast %42 : vector<1x128x128xf32> to vector<128x128xf32>
    %cst_49 = arith.constant dense<0.000000e+00> : vector<32x128xf32>
    %44 = tpu.matmul %41, %43, %cst_49 {dimension_numbers = #tpu.dot_dimension_numbers<[1], [0], [0], [1], [0, 0, 1, 1], [], []>} : vector<32x128xf32>, vector<128x128xf32>, vector<32x128xf32> -> vector<32x128xf32>
    %45 = arith.addf %40, %44 : vector<32x128xf32>
    %c2_50 = arith.constant 2 : index
    %c0_51 = arith.constant 0 : index
    %46 = vector.load %arg10[%c2_50, %c0_51] : memref<34x256xf32, #tpu.memory_space<vmem>>, vector<32x128xf32>
    %c2_52 = arith.constant 2 : index
    %c0_53 = arith.constant 0 : index
    %c0_54 = arith.constant 0 : index
    %47 = vector.load %arg7[%c2_52, %c0_53, %c0_54] : memref<3x128x128xf32, #tpu.memory_space<vmem>>, vector<1x128x128xf32>
    %48 = vector.shape_cast %47 : vector<1x128x128xf32> to vector<128x128xf32>
    %cst_55 = arith.constant dense<0.000000e+00> : vector<32x128xf32>
    %49 = tpu.matmul %46, %48, %cst_55 {dimension_numbers = #tpu.dot_dimension_numbers<[1], [0], [0], [1], [0, 0, 1, 1], [], []>} : vector<32x128xf32>, vector<128x128xf32>, vector<32x128xf32> -> vector<32x128xf32>
    %50 = arith.addf %45, %49 : vector<32x128xf32>
    %c0_56 = arith.constant 0 : index
    %c0_57 = arith.constant 0 : index
    %51 = vector.load %arg8[%c0_56, %c0_57] : memref<1x128xf32, #tpu.memory_space<vmem>>, vector<1x128xf32>
    %52 = vector.broadcast %51 : vector<1x128xf32> to vector<32x128xf32>
    %53 = arith.addf %50, %52 : vector<32x128xf32>
    %cst_58 = arith.constant 0.000000e+00 : f32
    %54 = vector.broadcast %cst_58 : f32 to vector<32x128xf32>
    %55 = arith.maximumf %53, %54 : vector<32x128xf32>
    %c0_59 = arith.constant 0 : index
    %c0_60 = arith.constant 0 : index
    %c0_61 = arith.constant 0 : index
    %56 = vector.load %arg9[%c0_59, %c0_60, %c0_61] : memref<1x32x128xf32, #tpu.memory_space<vmem>>, vector<1x32x128xf32>
    %57 = vector.shape_cast %56 : vector<1x32x128xf32> to vector<32x128xf32>
    %58 = vector.shape_cast %55 : vector<32x128xf32> to vector<1x32x128xf32>
    tpu.vector_store %arg9[%c0_59, %c0_60, %c0_61], %58 {strides = array<i32>} : memref<1x32x128xf32, #tpu.memory_space<vmem>>, vector<1x32x128xf32>,
    return
  }
  func.func @transform_0(%arg0: i32) -> (i32, i32, i32) {
    %c0_i32 = arith.constant 0 : i32
    %c0_i32_0 = arith.constant 0 : i32
    %c0_i32_1 = arith.constant 0 : i32
    return %arg0, %c0_i32, %c0_i32_0 : i32, i32, i32
  }
  func.func @transform_1(%arg0: i32) -> (i32, i32, i32) {
    %c0_i32 = arith.constant 0 : i32
    %c0_i32_0 = arith.constant 0 : i32
    %c0_i32_1 = arith.constant 0 : i32
    return %arg0, %c0_i32, %c0_i32_0 : i32, i32, i32
  }
  func.func @transform_2(%arg0: i32) -> (i32, i32) {
    %c0_i32 = arith.constant 0 : i32
    %c0_i32_0 = arith.constant 0 : i32
    %c0_i32_1 = arith.constant 0 : i32
    return %c0_i32, %c0_i32_0 : i32, i32
  }
  func.func @transform_3(%arg0: i32) -> (i32, i32) {
    %c0_i32 = arith.constant 0 : i32
    %c0_i32_0 = arith.constant 0 : i32
    %c0_i32_1 = arith.constant 0 : i32
    return %c0_i32, %c0_i32_0 : i32, i32
  }
  func.func @transform_4(%arg0: i32) -> (i32, i32, i32) {
    %c0_i32 = arith.constant 0 : i32
    %c0_i32_0 = arith.constant 0 : i32
    %c0_i32_1 = arith.constant 0 : i32
    %c0_i32_2 = arith.constant 0 : i32
    return %c0_i32, %c0_i32_0, %c0_i32_1 : i32, i32, i32
  }
  func.func @transform_5(%arg0: i32) -> (i32, i32) {
    %c0_i32 = arith.constant 0 : i32
    %c0_i32_0 = arith.constant 0 : i32
    %c0_i32_1 = arith.constant 0 : i32
    return %c0_i32, %c0_i32_0 : i32, i32
  }
  func.func @transform_6(%arg0: i32) -> (i32, i32, i32) {
    %c0_i32 = arith.constant 0 : i32
    %c0_i32_0 = arith.constant 0 : i32
    %c0_i32_1 = arith.constant 0 : i32
    %c0_i32_2 = arith.constant 0 : i32
    return %c0_i32, %c0_i32_0, %c0_i32_1 : i32, i32, i32
  }
  func.func @transform_7(%arg0: i32) -> (i32, i32) {
    %c0_i32 = arith.constant 0 : i32
    %c0_i32_0 = arith.constant 0 : i32
    %c0_i32_1 = arith.constant 0 : i32
    return %c0_i32, %c0_i32_0 : i32, i32
  }
  func.func @transform_8(%arg0: i32) -> (i32, i32, i32) {
    %c0_i32 = arith.constant 0 : i32
    %c0_i32_0 = arith.constant 0 : i32
    %c0_i32_1 = arith.constant 0 : i32
    return %arg0, %c0_i32, %c0_i32_0 : i32, i32, i32
  }
}

</mosaic_0001>

<bundles_post_ra>
// kernel: _lambda_.1
= control target key start
LH: loop header
LB: loop body
LE: loop exit
PB: predicated region body
PF: predicated region fallthrough
CT: control target
= control target key end

     0   :  { %s2195_s27 = smov 0   ;;  %s2917_s0 = inlined_call_operand.vmem [shape: f32[2,16,128], index: 0, kind: input, shape index: {}]   ;;  %s2918_s1 = inlined_call_operand.vmem [shape: f32[2,32,128], index: 1, kind: input, shape index: {}]   ;;  %s2919_s2 = inlined_call_operand.vmem [shape: f32[128,256], index: 2, kind: input, shape index: {}]   ;;  %s2920_s3 = inlined_call_operand.vmem [shape: f32[1,128], index: 3, kind: input, shape index: {}]   ;;  %s2921_s4 = inlined_call_operand.vmem [shape: f32[3,256,128], index: 4, kind: input, shape index: {}]   ;;  %s2922_s5 = inlined_call_operand.vmem [shape: f32[1,128], index: 5, kind: input, shape index: {}]   ;;  %s2923_s6 = inlined_call_operand.vmem [shape: f32[3,128,128], index: 6, kind: input, shape index: {}]   ;;  %s2924_s7 = inlined_call_operand.vmem [shape: f32[1,128], index: 7, kind: input, shape index: {}]   ;;  %s2925_s8 = inlined_call_operand.vmem [shape: f32[2,32,128], index: 8, kind: output, shape index: {}]  }
   0x1 LB: > { %s1461_s28 = sadd.s32 4294967295, %s2146_s27   ;;  %p1465_p0 = scmp.ge.s32.totalorder %s2146_s27, 1  ;;  %s2146_s27 = sphi %s2195_s27, %s18_s27  }
   0x2   : > { %p272_p1 = scmp.lt.s32.totalorder %s2146_s27, 3 }
   0x4   : > { %p273_p2 = pnand %p1465_p0, %p272_p1 }
   0x5   : > { %v338_v0 = vld [vmem:[%s2919_s2 + $0x8] sm:$0xff] (!%p273_p2)  ;;  %v340_v1 = vld [vmem:[%s2919_s2 + $0x18] sm:$0xff] (!%p273_p2)  ;;  %v337_v2 = vld [vmem:[%s2919_s2] sm:$0xff] (!%p273_p2)  ;;  %v326_v3 = vlaneseq (!%p273_p2)  ;;  %p2212_p3 = scmp.lt.s32.totalorder (!%p273_p2), %s1461_s28, 1  ;;  %v2148_v8 = vmov (!%p273_p2), 0.0   ;;  %vm505_vm1 = vcmask (!%p273_p2), 1040384  }
   0x6   : > { %276 = sbr.rel (%p273_p2) target bundleno = 824 (0x338), region = 52  ;;  %v1882_v4 = vpack.c.bf16 (!%p273_p2), %v340_v1, %v338_v0  ;;  %v339_v5 = vld [vmem:[%s2919_s2 + $0x10] sm:$0xff] (!%p273_p2)  ;;  %v342_v6 = vld [vmem:[%s2919_s2 + $0x28] sm:$0xff] (!%p273_p2)  ;;  %v344_v7 = vld [vmem:[%s2919_s2 + $0x38] sm:$0xff] (!%p273_p2)  ;;  %433 = vmatprep.mubr.f32.mxu1 (!%p273_p2), %v2148_v8  ;;  %vm635_vm2 = vcmask (!%p273_p2), 1046528   ;;  %vm873_vm3 = vcmask (!%p273_p2), 1045504  }
   0x7   : > { %v1884_v9 = vpack.c.bf16 (!%p273_p2), %v339_v5, %v337_v2  ;;  %v1886_v10 = vpack.c.bf16 (!%p273_p2), %v344_v7, %v342_v6  ;;  %v341_v11 = vld [vmem:[%s2919_s2 + $0x20] sm:$0xff] (!%p273_p2)  ;;  %v343_v12 = vld [vmem:[%s2919_s2 + $0x30] sm:$0xff] (!%p273_p2)  ;;  %v346_v13 = vld [vmem:[%s2919_s2 + $0x48] sm:$0xff] (!%p273_p2)  ;;  %vm328_vm0 = vcmp.lt.s32.totalorder (!%p273_p2), %v326_v3, 256 }
   0x8   : > { %1883 = vmatprep.subr.bf16.mxu1 (!%p273_p2), %v1882_v4  ;;  %v348_v14 = vld [vmem:[%s2919_s2 + $0x58] sm:$0xff] (!%p273_p2)  ;;  %330 = vst.msk [vmem:[#allocation2] ss:$8 sm:$0x3] (!%p273_p2), %vm328_vm0, %v2148_v8  ;;  %v1888_v15 = vpack.c.bf16 (!%p273_p2), %v343_v12, %v341_v11  ;;  %v345_v17 = vld [vmem:[%s2919_s2 + $0x40] sm:$0xff] (!%p273_p2)  ;;  %v347_v18 = vld [vmem:[%s2919_s2 + $0x50] sm:$0xff] (!%p273_p2) }
   0x9   : > { %333 = vst.msk [vmem:[#allocation2 + $0x41] ss:$8 sm:$0x3] (!%p273_p2), %vm328_vm0, %v2148_v8  ;;  %1885 = vmatpush1.bf16.msra.mxu1 (!%p273_p2), %v1884_v9  ;;  %v1890_v16 = vpack.c.bf16 (!%p273_p2), %v348_v14, %v346_v13  ;;  %v350_v19 = vld [vmem:[%s2919_s2 + $0x68] sm:$0xff] (!%p273_p2)  ;;  %v352_v20 = vld [vmem:[%s2919_s2 + $0x78] sm:$0xff] (!%p273_p2)  ;;  %v1892_v21 = vpack.c.bf16 (!%p273_p2), %v347_v18, %v345_v17  ;;  %v349_v23 = vld [vmem:[%s2919_s2 + $0x60] sm:$0xff] (!%p273_p2) }
   0xa   : > { %1887 = vmatprep.subr.bf16.mxu1 (!%p273_p2), %v1886_v10  ;;  %v1894_v22 = vpack.c.bf16 (!%p273_p2), %v352_v20, %v350_v19  ;;  %v351_v24 = vld [vmem:[%s2919_s2 + $0x70] sm:$0xff] (!%p273_p2)  ;;  %v354_v25 = vld [vmem:[%s2919_s2 + $0x88] sm:$0xff] (!%p273_p2)  ;;  %v356_v26 = vld [vmem:[%s2919_s2 + $0x98] sm:$0xff] (!%p273_p2) }
   0xb   : > { %v353_v27 = vld [vmem:[%s2919_s2 + $0x80] sm:$0xff] (!%p273_p2)  ;;  %v1896_v31 = vpack.c.bf16 (!%p273_p2), %v351_v24, %v349_v23  ;;  %v355_v32 = vld [vmem:[%s2919_s2 + $0x90] sm:$0xff] (!%p273_p2)  ;;  %v1898_v38 = vpack.c.bf16 (!%p273_p2), %v356_v26, %v354_v25  ;;  %v573_v40 = vld [vmem:[%s2921_s4 + $0x88] sm:$0xff] (!%p273_p2) }
   0xc   : > { %v572_v37 = vld [vmem:[%s2921_s4 + $0x80] sm:$0xff] (!%p273_p2)  ;;  %v557_v42 = vld [vmem:[%s2921_s4 + $0x8] sm:$0xff] (!%p273_p2)  ;;  %v360_v44 = vld [vmem:[%s2919_s2 + $0xb8] sm:$0xff] (!%p273_p2)  ;;  %v1900_v52 = vpack.c.bf16 (!%p273_p2), %v355_v32, %v353_v27 }
   0xd   : > { %s2928_s28 = smov (!%p2212_p3, %s1461_s28), 1  ;;  %1889 = vmatpush1.bf16.msra.mxu1 %v1888_v15  ;;  %v556_v41 = vld [vmem:[%s2921_s4] sm:$0xff]  ;;  %v358_v43 = vld [vmem:[%s2919_s2 + $0xa8] sm:$0xff]  ;;  %v1946_v47 = vpack.c.bf16 %v573_v40, %v572_v37  ;;  %v574_v50 = vld [vmem:[%s2921_s4 + $0x90] sm:$0xff] }
   0xe   : > { %s1574_s12 = sshll.u32 %s2928_s28, 5  ;;  %1891 = vmatprep.subr.bf16.mxu1 %v1890_v16  ;;  %v1948_v48 = vpack.c.bf16 %v557_v42, %v556_v41  ;;  %v575_v51 = vld [vmem:[%s2921_s4 + $0x98] sm:$0xff]  ;;  %v357_v53 = vld [vmem:[%s2919_s2 + $0xa0] sm:$0xff]  ;;  %v558_v55 = vld [vmem:[%s2921_s4 + $0x10] sm:$0xff]  ;;  %v1902_v57 = vpack.c.bf16 %v360_v44, %v358_v43  ;;  %s1573_s23 = sshll.u32 %s2928_s28, 4 }
   0xf   : > { %s320_s19 = scalar_lea.vmem %s2918_s1, %s1574_s12  ;;  %1947 = vmatprep.subr.bf16.mxu0 %v1946_v47  ;;  %v1950_v54 = vpack.c.bf16 %v575_v51, %v574_v50  ;;  %v559_v56 = vld [vmem:[%s2921_s4 + $0x18] sm:$0xff]  ;;  %v359_v58 = vld [vmem:[%s2919_s2 + $0xb0] sm:$0xff]  ;;  %v362_v59 = vld [vmem:[%s2919_s2 + $0xc8] sm:$0xff]  ;;  %s315_s10 = scalar_lea.vmem %s2917_s0, %s1573_s23 }
  0x10   : > { %v523_v28 = vld [vmem:[%s320_s19] sm:$0xff]  ;;  %v524_v29 = vld [vmem:[%s320_s19 + $0x8] sm:$0xff]  ;;  %v525_v30 = vld [vmem:[%s320_s19 + $0x10] sm:$0xff]  ;;  %1949 = vmatpush3.bf16.msra.mxu0 %v1948_v48  ;;  %v1952_v61 = vpack.c.bf16 %v559_v56, %v558_v55  ;;  %v1904_v4 = vpack.c.bf16 %v359_v58, %v357_v53  ;;  %s325_s13 = scalar_lea.vmem %s2925_s8, %s1574_s12 }
  0x11   : > { %1893 = vmatpush1.bf16.msra.mxu1 %v1892_v21  ;;  %v526_v33 = vld [vmem:[%s320_s19 + $0x18] sm:$0xff]  ;;  %v531_v34 = vrot.slane %v523_v28, 7  ;;  %v532_v35 = vrot.slane %v524_v29, 7  ;;  %v534_v36 = vrot.slane %v525_v30, 7  ;;  %1951 = vmatprep.subr.bf16.mxu0 %v1950_v54  ;;  %v576_v62 = vld [vmem:[%s2921_s4 + $0xa0] sm:$0xff]  ;;  %v577_v63 = vld [vmem:[%s2921_s4 + $0xa8] sm:$0xff] }
  0x12   : > { %1895 = vmatprep.subr.bf16.mxu1 %v1894_v22  ;;  %v536_v39 = vrot.slane %v526_v33, 7  ;;  %v364_v60 = vld [vmem:[%s2919_s2 + $0xd8] sm:$0xff]  ;;  %v560_v0 = vld [vmem:[%s2921_s4 + $0x20] sm:$0xff]  ;;  %v1954_v1 = vpack.c.bf16 %v577_v63, %v576_v62  ;;  %v561_v2 = vld [vmem:[%s2921_s4 + $0x28] sm:$0xff] }
  0x13   : > { %v2300_v45 = vsel %vm505_vm1, %v531_v34, %v532_v35  ;;  %v2303_v46 = vsel %vm505_vm1, %v532_v35, %v534_v36  ;;  %543 = vst [vmem:[#allocation2 + $0x8] sm:$0xfe] %v531_v34  ;;  %v1906_v5 = vpack.c.bf16 %v364_v60, %v362_v59  ;;  %v361_v6 = vld [vmem:[%s2919_s2 + $0xc0] sm:$0xff]  ;;  %v363_v7 = vld [vmem:[%s2919_s2 + $0xd0] sm:$0xff]  ;;  %v1956_v9 = vpack.c.bf16 %v561_v2, %v560_v0  ;;  %v366_v10 = vld [vmem:[%s2919_s2 + $0xe8] sm:$0xff] }
  0x14   : > { %v2306_v49 = vsel %vm505_vm1, %v534_v36, %v536_v39  ;;  %547 = vst [vmem:[#allocation2 + $0x48] sm:$0x1] %v536_v39  ;;  %1953 = vmatpush3.bf16.msra.mxu0 %v1952_v61  ;;  %v368_v11 = vld [vmem:[%s2919_s2 + $0xf8] sm:$0xff]  ;;  %v1908_v12 = vpack.c.bf16 %v363_v7, %v361_v6  ;;  %v365_v14 = vld [vmem:[%s2919_s2 + $0xe0] sm:$0xff]  ;;  %v367_v15 = vld [vmem:[%s2919_s2 + $0xf0] sm:$0xff] }
  0x15   : > { %1897 = vmatpush1.bf16.msra.mxu1 %v1896_v31  ;;  %1955 = vmatprep.subr.bf16.mxu0 %v1954_v1  ;;  %v1910_v13 = vpack.c.bf16 %v368_v11, %v366_v10  ;;  %v1489_v16 = vld [vmem:[%s2921_s4 + $0x180] sm:$0xff]  ;;  %v1490_v17 = vld [vmem:[%s2921_s4 + $0x188] sm:$0xff]  ;;  %v1912_v18 = vpack.c.bf16 %v367_v15, %v365_v14  ;;  %v1491_v22 = vld [vmem:[%s2921_s4 + $0x190] sm:$0xff] }
  0x16   : > { %1899 = vmatprep.subr.bf16.mxu1 %v1898_v38  ;;  %v1914_v19 = vpack.c.bf16 %v1490_v17, %v1489_v16  ;;  %v1473_v20 = vld [vmem:[%s2921_s4 + $0x100] sm:$0xff]  ;;  %v1474_v21 = vld [vmem:[%s2921_s4 + $0x108] sm:$0xff]  ;;  %v1492_v23 = vld [vmem:[%s2921_s4 + $0x198] sm:$0xff] }
  0x17   : > { %v335_v24 = vld [vmem:[%s315_s10] sm:$0xff]  ;;  %v1916_v25 = vpack.c.bf16 %v1474_v21, %v1473_v20  ;;  %v1918_v26 = vpack.c.bf16 %v1492_v23, %v1491_v22  ;;  %v1475_v27 = vld [vmem:[%s2921_s4 + $0x110] sm:$0xff]  ;;  %v1476_v28 = vld [vmem:[%s2921_s4 + $0x118] sm:$0xff] }
  0x18   : > { %1957 = vmatpush3.bf16.msra.mxu0 %v1956_v9  ;;  %v1493_v29 = vld [vmem:[%s2921_s4 + $0x1a0] sm:$0xff]  ;;  %v1494_v30 = vld [vmem:[%s2921_s4 + $0x1a8] sm:$0xff]  ;;  %v1920_v32 = vpack.c.bf16 %v1476_v28, %v1475_v27  ;;  %v579_v37 = vld [vmem:[%s2921_s4 + $0xb8] sm:$0xff] }
  0x19   : > { %1901 = vmatpush1.bf16.msra.mxu1 %v1900_v52  ;;  %v336_v31 = vld [vmem:[%s315_s10 + $0x8] sm:$0xff]  ;;  %v1922_v33 = vpack.c.bf16 %v1494_v30, %v1493_v29  ;;  %v1477_v34 = vld [vmem:[%s2921_s4 + $0x120] sm:$0xff]  ;;  %v562_v39 = vld [vmem:[%s2921_s4 + $0x30] sm:$0xff] }
  0x1a   : > { %1903 = vmatprep.subr.bf16.mxu1 %v1902_v57  ;;  %v1478_v35 = vld [vmem:[%s2921_s4 + $0x128] sm:$0xff]  ;;  %v563_v40 = vld [vmem:[%s2921_s4 + $0x38] sm:$0xff]  ;;  %v1495_v42 = vld [vmem:[%s2921_s4 + $0x1b0] sm:$0xff] }
  0x1b   : > { %v1924_v36 = vpack.c.bf16 %v1478_v35, %v1477_v34  ;;  %v1960_v41 = vpack.c.bf16 %v563_v40, %v562_v39  ;;  %v1496_v43 = vld [vmem:[%s2921_s4 + $0x1b8] sm:$0xff]  ;;  %v1479_v47 = vld [vmem:[%s2921_s4 + $0x130] sm:$0xff]  ;;  %v580_v51 = vld [vmem:[%s2921_s4 + $0xc0] sm:$0xff]  ;;  %v640_v39 = vrot.slane %v2300_v45, 1 }
  0x1c   : > { %v1926_v44 = vpack.c.bf16 %v1496_v43, %v1495_v42  ;;  %v1480_v48 = vld [vmem:[%s2921_s4 + $0x138] sm:$0xff]  ;;  %v581_v52 = vld [vmem:[%s2921_s4 + $0xc8] sm:$0xff]  ;;  %v564_v54 = vld [vmem:[%s2921_s4 + $0x40] sm:$0xff] }
  0x1d   : > { %1905 = vmatpush1.bf16.msra.mxu1 %v1904_v4  ;;  %v1928_v50 = vpack.c.bf16 %v1480_v48, %v1479_v47  ;;  %v1962_v53 = vpack.c.bf16 %v581_v52, %v580_v51  ;;  %v565_v55 = vld [vmem:[%s2921_s4 + $0x48] sm:$0xff]  ;;  %v1497_v57 = vld [vmem:[%s2921_s4 + $0x1c0] sm:$0xff]  ;;  %v582_v63 = vld [vmem:[%s2921_s4 + $0xd0] sm:$0xff]  ;;  %v462_v48 = vshrl.u32 %v326_v3, 7 }
  0x1e   : > { %1907 = vmatprep.subr.bf16.mxu1 %v1906_v5  ;;  %v1964_v56 = vpack.c.bf16 %v565_v55, %v564_v54  ;;  %v1498_v58 = vld [vmem:[%s2921_s4 + $0x1c8] sm:$0xff]  ;;  %v1481_v60 = vld [vmem:[%s2921_s4 + $0x140] sm:$0xff]  ;;  %v583_v0 = vld [vmem:[%s2921_s4 + $0xd8] sm:$0xff] }
  0x1f   : > { %v1930_v59 = vpack.c.bf16 %v1498_v58, %v1497_v57  ;;  %v1482_v61 = vld [vmem:[%s2921_s4 + $0x148] sm:$0xff]  ;;  %v1966_v1 = vpack.c.bf16 %v583_v0, %v582_v63  ;;  %v566_v2 = vld [vmem:[%s2921_s4 + $0x50] sm:$0xff]  ;;  %v567_v4 = vld [vmem:[%s2921_s4 + $0x58] sm:$0xff] }
  0x20   : > { %v1932_v62 = vpack.c.bf16 %v1482_v61, %v1481_v60  ;;  %v1968_v5 = vpack.c.bf16 %v567_v4, %v566_v2  ;;  %v1499_v6 = vld [vmem:[%s2921_s4 + $0x1d0] sm:$0xff]  ;;  %v1500_v7 = vld [vmem:[%s2921_s4 + $0x1d8] sm:$0xff]  ;;  %v585_v14 = vld [vmem:[%s2921_s4 + $0xe8] sm:$0xff] }
  0x21   : > { %1909 = vmatpush1.bf16.msra.mxu1 %v1908_v12  ;;  %v1934_v9 = vpack.c.bf16 %v1500_v7, %v1499_v6  ;;  %v1483_v10 = vld [vmem:[%s2921_s4 + $0x150] sm:$0xff]  ;;  %v1484_v11 = vld [vmem:[%s2921_s4 + $0x158] sm:$0xff]  ;;  %v568_v16 = vld [vmem:[%s2921_s4 + $0x60] sm:$0xff] }
  0x22   : > { %1911 = vmatprep.subr.bf16.mxu1 %v1910_v13  ;;  %v1936_v12 = vpack.c.bf16 %v1484_v11, %v1483_v10  ;;  %v584_v13 = vld [vmem:[%s2921_s4 + $0xe0] sm:$0xff]  ;;  %v569_v17 = vld [vmem:[%s2921_s4 + $0x68] sm:$0xff]  ;;  %v570_v28 = vld [vmem:[%s2921_s4 + $0x70] sm:$0xff] }
  0x23   : > { %v1970_v15 = vpack.c.bf16 %v585_v14, %v584_v13  ;;  %v1502_v20 = vld [vmem:[%s2921_s4 + $0x1e8] sm:$0xff]  ;;  %v1485_v22 = vld [vmem:[%s2921_s4 + $0x160] sm:$0xff]  ;;  %v571_v29 = vld [vmem:[%s2921_s4 + $0x78] sm:$0xff] }
  0x24   : > { %v1486_v23 = vld [vmem:[%s2921_s4 + $0x168] sm:$0xff]  ;;  %v1976_v30 = vpack.c.bf16 %v571_v29, %v570_v28  ;;  %v1487_v35 = vld [vmem:[%s2921_s4 + $0x170] sm:$0xff]  ;;  %v1521_v40 = vld [vmem:[%s2921_s4 + $0x280] sm:$0xff] }
  0x25   : > { %1913 = vmatpush1.bf16.msra.mxu1 %v1912_v18  ;;  %v1972_v18 = vpack.c.bf16 %v569_v17, %v568_v16  ;;  %v549_v34 = vld [vmem:[#allocation2 + $0x8] sm:$0xff]  ;;  %v1524_v29 = vld [vmem:[%s2921_s4 + $0x298] sm:$0xff] }
  0x26   : > { %1915 = vmatprep.subr.bf16.mxu1 %v1914_v19  ;;  %v1501_v19 = vld [vmem:[%s2921_s4 + $0x1e0] sm:$0xff]  ;;  %811 = vmatprep.mubr.f32.mxu0 %v549_v34 }
  0x27   : > { %v1938_v21 = vpack.c.bf16 %v1502_v20, %v1501_v19  ;;  %v1505_v19 = vld [vmem:[%s2921_s4 + $0x200] sm:$0xff]  ;;  %v1506_v20 = vld [vmem:[%s2921_s4 + $0x208] sm:$0xff] }
  0x28   : > { %434 = vmatmul.mubr.f32.vlgmr.msra.gmra.mrb[0].mxu1 %v335_v24  ;;  %v1940_v24 = vpack.c.bf16 %v1486_v23, %v1485_v22 }
  0x29   : > { %439 = vmatprep.mubr.f32.mxu1 %v2148_v8  ;;  %1917 = vmatpush3.bf16.msra.mxu1 %v1916_v25  ;;  %v578_v8 = vld [vmem:[%s2921_s4 + $0xb0] sm:$0xff] }
  0x2a   : > { %1919 = vmatprep.subr.bf16.mxu1 %v1918_v26  ;;  %v1958_v38 = vpack.c.bf16 %v579_v37, %v578_v8  ;;  %v586_v25 = vld [vmem:[%s2921_s4 + $0xf0] sm:$0xff]  ;;  %v587_v26 = vld [vmem:[%s2921_s4 + $0xf8] sm:$0xff]  ;;  %v589_v37 = vld [vmem:[#allocation2 + $0x8] sm:$0xfe] }
  0x2b   : > { %v1974_v27 = vpack.c.bf16 %v587_v26, %v586_v25  ;;  %v644_v25 = vrot.slane %v2303_v46, 1  ;;  %v1523_v26 = vld [vmem:[%s2921_s4 + $0x290] sm:$0xff] }
  0x2c   : > { %440 = vmatmul.mubr.f32.gmra.mrb[2].mxu1 %v336_v31  ;;  %1959 = vmatprep.subr.bf16.mxu0 %v1958_v38  ;;  %v1503_v31 = vld [vmem:[%s2921_s4 + $0x1f0] sm:$0xff]  ;;  %v639_v38 = vrot.slane %v589_v37, 1 }
  0x2d   : > { %1921 = vmatpush3.bf16.msra.mxu1 %v1920_v32  ;;  %1961 = vmatpush3.bf16.msra.mxu0 %v1960_v41  ;;  %v1504_v32 = vld [vmem:[%s2921_s4 + $0x1f8] sm:$0xff]  ;;  %v1522_v41 = vld [vmem:[%s2921_s4 + $0x288] sm:$0xff] }
  0x2e   : > { %1923 = vmatprep.subr.bf16.mxu1 %v1922_v33  ;;  %1963 = vmatprep.subr.bf16.mxu0 %v1962_v53  ;;  %v1942_v33 = vpack.c.bf16 %v1504_v32, %v1503_v31  ;;  %v1978_v42 = vpack.c.bf16 %v1522_v41, %v1521_v40  ;;  %v641_v43 = vsel %vm635_vm2, %v639_v38, %v640_v39  ;;  %v648_v41 = vrot.slane %v2306_v49, 1 }
  0x2f   : > { %726 = vmatprep.mubr.f32.mxu1 %v641_v43  ;;  %v645_v38 = vsel %vm635_vm2, %v640_v39, %v644_v25  ;;  %v1982_v40 = vpack.c.bf16 %v1524_v29, %v1523_v26  ;;  %v1526_v43 = vld [vmem:[%s2921_s4 + $0x2a8] sm:$0xff]  ;;  %v1536_v26 = vld [vmem:[%s2921_s4 + $0x2f8] sm:$0xff]  ;;  %v1519_v29 = vld [vmem:[%s2921_s4 + $0x270] sm:$0xff] }
  0x31   : > { %1925 = vmatpush3.bf16.msra.mxu1 %v1924_v36  ;;  %1965 = vmatpush3.bf16.msra.mxu0 %v1964_v56  ;;  %v1488_v36 = vld [vmem:[%s2921_s4 + $0x178] sm:$0xff]  ;;  %v1472_v56 = vld [vmem:[%s2920_s3] ss:$0 sm:$0xff] }
  0x32   : > { %1927 = vmatprep.subr.bf16.mxu1 %v1926_v44  ;;  %1967 = vmatprep.subr.bf16.mxu0 %v1966_v1  ;;  %v1944_v8 = vpack.c.bf16 %v1488_v36, %v1487_v35  ;;  %v2149_v44 = vmov 1935823168   ;;  %v1980_v35 = vpack.c.bf16 %v1506_v20, %v1505_v19  ;;  %v1507_v36 = vld [vmem:[%s2921_s4 + $0x210] sm:$0xff]  ;;  %v1534_v19 = vld [vmem:[%s2921_s4 + $0x2e8] sm:$0xff] }
  0x33   : > { %v459_v47 = vunpack.c.l.s4 %v2149_v44  ;;  %v591_v44 = vld [vmem:[#allocation2 + $0x48] sm:$0x1] }
  0x35   : > { %1929 = vmatpush3.bf16.msra.mxu1 %v1928_v50  ;;  %1969 = vmatpush3.bf16.msra.mxu0 %v1968_v5  ;;  %v460_v50 = vunpack.c.0.s8 %v459_v47 }
  0x36   : > { %1931 = vmatprep.subr.bf16.mxu1 %v1930_v59  ;;  %1971 = vmatprep.subr.bf16.mxu0 %v1970_v15 }
  0x37   : > { %v463_v52 = vsub.s32 %v460_v50, %v462_v48  ;;  %v1509_v48 = vld [vmem:[%s2921_s4 + $0x220] sm:$0xff]  ;;  %v1510_v50 = vld [vmem:[%s2921_s4 + $0x228] sm:$0xff] }
  0x39   : > { %1933 = vmatpush3.bf16.msra.mxu1 %v1932_v62  ;;  %1973 = vmatpush3.bf16.msra.mxu0 %v1972_v18 }
  0x3a   : > { %1935 = vmatprep.subr.bf16.mxu1 %v1934_v9  ;;  %1975 = vmatprep.subr.bf16.mxu0 %v1974_v27 }
  0x3d   : > { %1937 = vmatpush3.bf16.msra.mxu1 %v1936_v12  ;;  %1977 = vmatpush3.bf16.msra.mxu0 %v1976_v30 }
  0x3e   : > { %1939 = vmatprep.subr.bf16.mxu1 %v1938_v21 }
  0x41   : > { %1941 = vmatpush3.bf16.msra.mxu1 %v1940_v24 }
  0x42   : > { %1943 = vmatprep.subr.bf16.mxu1 %v1942_v33 }
  0x45   : > { %1945 = vmatpush3.bf16.msra.mxu1 %v1944_v8  ;;  %v1508_v8 = vld [vmem:[%s2921_s4 + $0x218] sm:$0xff] }
  0x46   : > { %1979 = vmatprep.subr.bf16.mxu1 %v1978_v42  ;;  %v1525_v42 = vld [vmem:[%s2921_s4 + $0x2a0] sm:$0xff]  ;;  %v1984_v47 = vpack.c.bf16 %v1508_v8, %v1507_v36 }
  0x47   : > { %v1986_v39 = vpack.c.bf16 %v1526_v43, %v1525_v42 }
  0xfb   : > { %v435_v51 = vpop.f32.mrb[0].mxu1 }
  0xfc   : > { %v437_v53 = vpop.f32.mrb[1].mxu1 }
  0xfd   : > { %v450_v54 = vcombine.low %v435_v51, %v437_v53  ;;  %v451_v55 = vcombine.high %v435_v51, %v437_v53  ;;  %v652_v51 = vrot.slane %v591_v44, 1  ;;  %v649_v53 = vsel %vm635_vm2, %v644_v25, %v648_v41  ;;  %v1535_v25 = vld [vmem:[%s2921_s4 + $0x2f0] sm:$0xff] }
  0xff   : > { %v464_v57 = vrot.slane %v450_v54, %v463_v52  ;;  %v471_v58 = vrot.slane %v451_v55, %v463_v52  ;;  %v441_v59 = vpop.f32.mrb[2].mxu1  ;;  %v1527_v54 = vld [vmem:[%s2921_s4 + $0x2b0] sm:$0xff]  ;;  %v1528_v55 = vld [vmem:[%s2921_s4 + $0x2b8] sm:$0xff] }
 0x100   : > { %v443_v60 = vpop.f32.mrb[3].mxu1 }
 0x101   : > { %v493_v61 = vadd.f32 %v1472_v56, %v464_v57  ;;  %v494_v62 = vadd.f32 %v1472_v56, %v471_v58  ;;  %v452_v63 = vcombine.low %v441_v59, %v443_v60  ;;  %v453_v0 = vcombine.high %v441_v59, %v443_v60  ;;  %v1511_v60 = vld [vmem:[%s2921_s4 + $0x230] sm:$0xff] }
 0x102   : > { %v1988_v57 = vpack.c.bf16 %v1510_v50, %v1509_v48  ;;  %v1990_v59 = vpack.c.bf16 %v1528_v55, %v1527_v54  ;;  %v1554_v50 = vld [vmem:[%s2923_s6 + $0x100] sm:$0xff]  ;;  %v1545_v54 = vld [vmem:[%s2923_s6 + $0xb8] sm:$0xff] }
 0x103   : > { %v497_v1 = vmax.f32 %v493_v61, 0.0  ;;  %v498_v3 = vmax.f32 %v494_v62, 0.0  ;;  %v478_v2 = vrot.slane %v452_v63, %v463_v52  ;;  %v485_v4 = vrot.slane %v453_v0, %v463_v52  ;;  %v1512_v61 = vld [vmem:[%s2921_s4 + $0x238] sm:$0xff] }
 0x104   : > { %v653_v62 = vsel %vm635_vm2, %v648_v41, %v652_v51  ;;  %v878_v0 = vrot.slane %v2300_v45, 2  ;;  %v1555_v51 = vld [vmem:[%s2923_s6 + $0x108] sm:$0xff] }
 0x105   : > { %v506_v5 = vrot.slane %v497_v1, 7  ;;  %v507_v6 = vrot.slane %v498_v3, 7  ;;  %v495_v7 = vadd.f32 %v1472_v56, %v478_v2  ;;  %v496_v9 = vadd.f32 %v1472_v56, %v485_v4  ;;  %v833_v56 = vld [vmem:[#allocation2 + $0x8] sm:$0xfc]  ;;  %v1529_v1 = vld [vmem:[%s2921_s4 + $0x2c0] sm:$0xff] }
 0x106   : > { %v877_v63 = vrot.slane %v833_v56, 2  ;;  %v1530_v3 = vld [vmem:[%s2921_s4 + $0x2c8] sm:$0xff]  ;;  %v1992_v2 = vpack.c.bf16 %v1512_v61, %v1511_v60  ;;  %v1556_v56 = vld [vmem:[%s2923_s6 + $0x110] sm:$0xff] }
 0x107   : > { %v2538_v10 = vsel %vm505_vm1, %v506_v5, %v507_v6  ;;  %518 = vst [vmem:[#allocation2] sm:$0xfe] %v506_v5  ;;  %v499_v11 = vmax.f32 %v495_v7, 0.0  ;;  %v500_v12 = vmax.f32 %v496_v9, 0.0  ;;  %v1513_v5 = vld [vmem:[%s2921_s4 + $0x240] sm:$0xff]  ;;  %v1531_v9 = vld [vmem:[%s2921_s4 + $0x2d0] sm:$0xff] }
 0x108   : > { %v637_v17 = vrot.slane %v2538_v10, 1  ;;  %v875_v18 = vrot.slane %v2538_v10, 2  ;;  %v879_v7 = vsel %vm873_vm3, %v877_v63, %v878_v0  ;;  %v1547_v60 = vld [vmem:[%s2923_s6 + $0xc8] sm:$0xff] }
 0x109   : > { %v509_v13 = vrot.slane %v499_v11, 7  ;;  %v511_v14 = vrot.slane %v500_v12, 7  ;;  %v1532_v11 = vld [vmem:[%s2921_s4 + $0x2d8] sm:$0xff]  ;;  %v1559_v63 = vld [vmem:[%s2923_s6 + $0x128] sm:$0xff] }
 0x10b   : > { %v510_v15 = vsel %vm505_vm1, %v507_v6, %v509_v13  ;;  %v2542_v16 = vsel %vm505_vm1, %v509_v13, %v511_v14  ;;  %522 = vst [vmem:[#allocation2 + $0x40] sm:$0x1] %v511_v14  ;;  %v1514_v6 = vld [vmem:[%s2921_s4 + $0x248] sm:$0xff]  ;;  %v1998_v13 = vpack.c.bf16 %v1532_v11, %v1531_v9  ;;  %v1515_v14 = vld [vmem:[%s2921_s4 + $0x250] sm:$0xff]  ;;  %v1562_v11 = vld [vmem:[%s2923_s6 + $0x140] sm:$0xff] }
 0x10c   : > { %v642_v21 = vrot.slane %v510_v15, 1  ;;  %v646_v22 = vrot.slane %v2542_v16, 1  ;;  %v880_v23 = vrot.slane %v510_v15, 2  ;;  %v884_v24 = vrot.slane %v2542_v16, 2 }
 0x10d   : > { %v1996_v12 = vpack.c.bf16 %v1514_v6, %v1513_v5  ;;  %v1550_v5 = vld [vmem:[%s2923_s6 + $0xe0] sm:$0xff] }
 0x10e   : > { %v548_v27 = vld [vmem:[#allocation2] sm:$0xff]  ;;  %v643_v30 = vsel %vm635_vm2, %v637_v17, %v642_v21  ;;  %v647_v31 = vsel %vm635_vm2, %v642_v21, %v646_v22  ;;  %v2566_v32 = vsel %vm873_vm3, %v875_v18, %v880_v23  ;;  %v2571_v33 = vsel %vm873_vm3, %v880_v23, %v884_v24  ;;  %v1518_v23 = vld [vmem:[%s2921_s4 + $0x268] sm:$0xff] }
 0x10f   : > { %v588_v28 = vld [vmem:[#allocation2] sm:$0xfe]  ;;  %812 = vmatmul.mubr.f32.vlgmr.msra.gmra.mrb[0].mxu0 %v548_v27 }
 0x110   : > { %v636_v34 = vrot.slane %v588_v28, 1  ;;  %816 = vmatprep.mubr.f32.mxu0 %v2300_v45  ;;  %v1994_v45 = vpack.c.bf16 %v1530_v3, %v1529_v1  ;;  %v2006_v28 = vpack.c.bf16 %v1536_v26, %v1535_v25  ;;  %v1549_v3 = vld [vmem:[%s2923_s6 + $0xd8] sm:$0xff]  ;;  %v1566_v26 = vld [vmem:[%s2923_s6 + $0x160] sm:$0xff] }
 0x112   : > { %v638_v37 = vsel %vm635_vm2, %v636_v34, %v637_v17  ;;  %v590_v52 = vld [vmem:[#allocation2 + $0x40] sm:$0x1] }
 0x113   : > { %727 = vmatmul.mubr.f32.vlgmr.msra.gmra.mrb[4].mxu1 %v638_v37  ;;  %817 = vmatmul.mubr.f32.gmra.mrb[2].mxu0 %v2538_v10  ;;  %v650_v58 = vrot.slane %v590_v52, 1  ;;  %v1533_v17 = vld [vmem:[%s2921_s4 + $0x2e0] sm:$0xff]  ;;  %v886_v37 = vrot.slane %v2306_v49, 2  ;;  %v1544_v52 = vld [vmem:[%s2923_s6 + $0xb0] sm:$0xff] }
 0x114   : > { %1981 = vmatpush3.bf16.msra.mxu1 %v1980_v35  ;;  %731 = vmatprep.mubr.f32.mxu1 %v645_v38  ;;  %v2002_v21 = vpack.c.bf16 %v1534_v19, %v1533_v17  ;;  %v882_v35 = vrot.slane %v2303_v46, 2  ;;  %v834_v43 = vld [vmem:[#allocation2 + $0x40] sm:$0x3]  ;;  %v2022_v55 = vpack.c.bf16 %v1545_v54, %v1544_v52  ;;  %v1564_v19 = vld [vmem:[%s2923_s6 + $0x150] sm:$0xff] }
 0x115   : > { %821 = vmatprep.mubr.f32.mxu0 %v2303_v46  ;;  %1983 = vmatprep.subr.bf16.mxu1 %v1982_v40  ;;  %v651_v4 = vsel %vm635_vm2, %v646_v22, %v650_v58  ;;  %v1517_v22 = vld [vmem:[%s2921_s4 + $0x260] sm:$0xff]  ;;  %v835_v40 = vld [vmem:[#allocation2 + $0x48] sm:$0x3]  ;;  %v888_v44 = vrot.slane %v834_v43, 2 }
 0x116   : > { %v2004_v27 = vpack.c.bf16 %v1518_v23, %v1517_v22  ;;  %v883_v8 = vsel %vm873_vm3, %v878_v0, %v882_v35  ;;  %v887_v41 = vsel %vm873_vm3, %v882_v35, %v886_v37  ;;  %v890_v42 = vrot.slane %v835_v40, 2  ;;  %v1538_v10 = vld [vmem:[%s2923_s6 + $0x80] sm:$0xff]  ;;  %v1548_v0 = vld [vmem:[%s2923_s6 + $0xd0] sm:$0xff]  ;;  %v1030_v23 = vld [vmem:[%s2923_s6 + $0x8] sm:$0xff] }
 0x117   : > { %732 = vmatmul.mubr.f32.gmra.mrb[6].mxu1 %v643_v30  ;;  %822 = vmatmul.mubr.f32.gmra.mrb[4].mxu0 %v510_v15  ;;  %v1516_v15 = vld [vmem:[%s2921_s4 + $0x258] sm:$0xff] }
 0x118   : > { %1985 = vmatpush3.bf16.msra.mxu1 %v1984_v47  ;;  %736 = vmatprep.mubr.f32.mxu1 %v649_v53  ;;  %v2000_v20 = vpack.c.bf16 %v1516_v15, %v1515_v14  ;;  %v1520_v30 = vld [vmem:[%s2921_s4 + $0x278] sm:$0xff]  ;;  %v891_v46 = vsel %vm873_vm3, %v886_v37, %v890_v42  ;;  %v1542_v47 = vld [vmem:[%s2923_s6 + $0xa0] sm:$0xff]  ;;  %v2706_v53 = vpack.c.bf16 %v1555_v51, %v1554_v50 }
 0x119   : > { %1987 = vmatprep.subr.bf16.mxu1 %v1986_v39  ;;  %826 = vmatprep.mubr.f32.mxu0 %v2306_v49  ;;  %v2008_v34 = vpack.c.bf16 %v1520_v30, %v1519_v29  ;;  %v889_v49 = vsel %vm873_vm3, %v884_v24, %v888_v44  ;;  %v1543_v39 = vld [vmem:[%s2923_s6 + $0xa8] sm:$0xff]  ;;  %v1553_v15 = vld [vmem:[%s2923_s6 + $0xf8] sm:$0xff]  ;;  %v1568_v29 = vld [vmem:[%s2923_s6 + $0x170] sm:$0xff] }
 0x11a   : > { %v2018_v48 = vpack.c.bf16 %v1543_v39, %v1542_v47  ;;  %v1569_v30 = vld [vmem:[%s2923_s6 + $0x178] sm:$0xff] }
 0x11b   : > { %737 = vmatmul.mubr.f32.gmra.mrb[8].mxu1 %v647_v31  ;;  %827 = vmatmul.mubr.f32.gmra.mrb[6].mxu0 %v2542_v16  ;;  %v832_v31 = vld [vmem:[#allocation2] sm:$0xfc]  ;;  %v1541_v16 = vld [vmem:[%s2923_s6 + $0x98] sm:$0xff] }
 0x11c   : > { %1989 = vmatpush3.bf16.msra.mxu1 %v1988_v57  ;;  %741 = vmatprep.mubr.f32.mxu1 %v653_v62  ;;  %v874_v36 = vrot.slane %v832_v31, 2  ;;  %v1557_v57 = vld [vmem:[%s2923_s6 + $0x118] sm:$0xff]  ;;  %v1558_v62 = vld [vmem:[%s2923_s6 + $0x120] sm:$0xff]  ;;  %v2810_v31 = vpack.c.bf16 %v1569_v30, %v1568_v29 }
 0x11d   : > { %1991 = vmatprep.subr.bf16.mxu1 %v1990_v59  ;;  %v2719_v58 = vpack.c.bf16 %v1557_v57, %v1556_v56  ;;  %v1546_v59 = vld [vmem:[%s2923_s6 + $0xc0] sm:$0xff]  ;;  %v2738_v1 = vpack.c.bf16 %v1559_v63, %v1558_v62 }
 0x11e   : > { %v876_v38 = vsel %vm873_vm3, %v874_v36, %v875_v18  ;;  %v1539_v18 = vld [vmem:[%s2923_s6 + $0x88] sm:$0xff]  ;;  %v2026_v61 = vpack.c.bf16 %v1547_v60, %v1546_v59 }
 0x11f   : > { %742 = vmatmul.mubr.f32.gmra.mrb[10].mxu1 %v651_v4  ;;  %v1560_v4 = vld [vmem:[%s2923_s6 + $0x130] sm:$0xff] }
 0x120   : > { %1993 = vmatpush3.bf16.msra.mxu1 %v1992_v2  ;;  %964 = vmatprep.mubr.f32.mxu1 %v879_v7  ;;  %v2030_v2 = vpack.c.bf16 %v1549_v3, %v1548_v0  ;;  %v1551_v7 = vld [vmem:[%s2923_s6 + $0xe8] sm:$0xff] }
 0x121   : > { %1995 = vmatprep.subr.bf16.mxu1 %v1994_v45  ;;  %v1561_v45 = vld [vmem:[%s2923_s6 + $0x138] sm:$0xff]  ;;  %v2034_v9 = vpack.c.bf16 %v1551_v7, %v1550_v5 }
 0x122   : > { %v2754_v6 = vpack.c.bf16 %v1561_v45, %v1560_v4 }
 0x124   : > { %1997 = vmatpush3.bf16.msra.mxu1 %v1996_v12  ;;  %v1563_v12 = vld [vmem:[%s2923_s6 + $0x148] sm:$0xff] }
 0x125   : > { %1999 = vmatprep.subr.bf16.mxu1 %v1998_v13  ;;  %v1552_v13 = vld [vmem:[%s2923_s6 + $0xf0] sm:$0xff]  ;;  %v2770_v14 = vpack.c.bf16 %v1563_v12, %v1562_v11 }
 0x126   : > { %v2038_v17 = vpack.c.bf16 %v1553_v15, %v1552_v13 }
 0x128   : > { %2001 = vmatpush3.bf16.msra.mxu1 %v2000_v20  ;;  %v1565_v20 = vld [vmem:[%s2923_s6 + $0x158] sm:$0xff] }
 0x129   : > { %2003 = vmatprep.subr.bf16.mxu1 %v2002_v21  ;;  %v1029_v21 = vld [vmem:[%s2923_s6] sm:$0xff]  ;;  %v2786_v22 = vpack.c.bf16 %v1565_v20, %v1564_v19 }
 0x12a   : > { %v2791_v25 = vpack.c.bf16 %v1030_v23, %v1029_v21 }
 0x12c   : > { %2005 = vmatpush3.bf16.msra.mxu1 %v2004_v27  ;;  %v1567_v27 = vld [vmem:[%s2923_s6 + $0x168] sm:$0xff] }
 0x12d   : > { %2007 = vmatprep.subr.bf16.mxu1 %v2006_v28  ;;  %v2802_v28 = vpack.c.bf16 %v1567_v27, %v1566_v26 }
 0x130   : > { %2009 = vmatpush3.bf16.msra.mxu1 %v2008_v34 }
 0x131   : > { %2106 = vmatprep.subr.bf16.mxu1 %v2706_v53 }
 0x133   : > { %965 = vmatmul.mubr.f32.vlgmr.msra.gmra.mrb[12].mxu1 %v876_v38 }
 0x134   : > { %969 = vmatprep.mubr.f32.mxu1 %v883_v8  ;;  %2114 = vmatpush3.bf16.msra.mxu1 %v2706_v53 }
 0x135   : > { %2107 = vmatprep.subr.bf16.mxu1 %v2719_v58 }
 0x137   : > { %970 = vmatmul.mubr.f32.gmra.mrb[14].mxu1 %v2566_v32  ;;  %v2010_v32 = vpack.c.bf16 %v1539_v18, %v1538_v10 }
 0x138   : > { %974 = vmatprep.mubr.f32.mxu1 %v887_v41  ;;  %2115 = vmatpush3.bf16.msra.mxu1 %v2719_v58 }
 0x139   : > { %2011 = vmatprep.subr.bf16.mxu0 %v2010_v32  ;;  %2108 = vmatprep.subr.bf16.mxu1 %v2738_v1 }
 0x13a   : > { %2013 = vmatpush3.bf16.msra.mxu0 %v2010_v32 }
 0x13b   : > { %975 = vmatmul.mubr.f32.gmra.mrb[16].mxu1 %v2571_v33  ;;  %v1540_v33 = vld [vmem:[%s2923_s6 + $0x90] sm:$0xff] }
 0x13c   : > { %979 = vmatprep.mubr.f32.mxu1 %v891_v46  ;;  %v2014_v24 = vpack.c.bf16 %v1541_v16, %v1540_v33  ;;  %2116 = vmatpush3.bf16.msra.mxu1 %v2738_v1 }
 0x13d   : > { %2109 = vmatprep.subr.bf16.mxu1 %v2754_v6 }
 0x13e   : > { %2015 = vmatprep.subr.bf16.mxu0 %v2014_v24 }
 0x13f   : > { %980 = vmatmul.mubr.f32.gmra.mrb[18].mxu1 %v889_v49  ;;  %2017 = vmatpush3.bf16.msra.mxu0 %v2014_v24 }
 0x140   : > { %2019 = vmatprep.subr.bf16.mxu0 %v2018_v48  ;;  %2117 = vmatpush3.bf16.msra.mxu1 %v2754_v6 }
 0x141   : > { %2110 = vmatprep.subr.bf16.mxu1 %v2770_v14 }
 0x143   : > { %2021 = vmatpush3.bf16.msra.mxu0 %v2018_v48 }
 0x144   : > { %2023 = vmatprep.subr.bf16.mxu0 %v2022_v55  ;;  %2118 = vmatpush3.bf16.msra.mxu1 %v2770_v14 }
 0x145   : > { %2111 = vmatprep.subr.bf16.mxu1 %v2786_v22 }
 0x147   : > { %2025 = vmatpush3.bf16.msra.mxu0 %v2022_v55 }
 0x148   : > { %2027 = vmatprep.subr.bf16.mxu0 %v2026_v61  ;;  %2119 = vmatpush3.bf16.msra.mxu1 %v2786_v22 }
 0x149   : > { %2112 = vmatprep.subr.bf16.mxu1 %v2802_v28 }
 0x14b   : > { %2029 = vmatpush3.bf16.msra.mxu0 %v2026_v61  ;;  %v1537_v61 = vld [vmem:[%s2922_s5] ss:$0 sm:$0xff] }
 0x14c   : > { %2031 = vmatprep.subr.bf16.mxu0 %v2030_v2  ;;  %2120 = vmatpush3.bf16.msra.mxu1 %v2802_v28 }
 0x14d   : > { %2113 = vmatprep.subr.bf16.mxu1 %v2810_v31 }
 0x14f   : > { %2033 = vmatpush3.bf16.msra.mxu0 %v2030_v2 }
 0x150   : > { %2035 = vmatprep.subr.bf16.mxu0 %v2034_v9  ;;  %2121 = vmatpush3.bf16.msra.mxu1 %v2810_v31 }
 0x153   : > { %2037 = vmatpush3.bf16.msra.mxu0 %v2034_v9 }
 0x154   : > { %2039 = vmatprep.subr.bf16.mxu0 %v2038_v17 }
 0x157   : > { %2041 = vmatpush3.bf16.msra.mxu0 %v2038_v17 }
 0x158   : > { %2043 = vmatprep.subr.bf16.mxu0 %v2791_v25 }
 0x1e2   : > { %v1652_v34 = vpop.f32.mrb[0].mxu0 }
 0x1e3   : > { %v1653_v35 = vpop.f32.mrb[1].mxu0 }
 0x1e4   : > { %v1654_v36 = vadd.f32 %v1653_v35, %v1652_v34 }
 0x1e6   : > { %v1608_v8 = vpop.f32.mrb[4].mxu1  ;;  %v1655_v37 = vpop.f32.mrb[2].mxu0 }
 0x1e7   : > { %v1609_v38 = vpop.f32.mrb[5].mxu1  ;;  %v1656_v41 = vpop.f32.mrb[3].mxu0 }
 0x1e8   : > { %v1610_v40 = vadd.f32 %v1609_v38, %v1608_v8  ;;  %v1657_v42 = vadd.f32 %v1656_v41, %v1655_v37  ;;  %v1032_v8 = vld [vmem:[%s2923_s6 + $0x18] sm:$0xff] }
 0x1ea   : > { %v814_v43 = vadd.f32 %v1654_v36, %v1610_v40  ;;  %v1611_v46 = vpop.f32.mrb[6].mxu1  ;;  %v1658_v44 = vpop.f32.mrb[4].mxu0  ;;  %v1031_v36 = vld [vmem:[%s2923_s6 + $0x10] sm:$0xff] }
 0x1eb   : > { %v1612_v49 = vpop.f32.mrb[7].mxu1  ;;  %v1659_v18 = vpop.f32.mrb[5].mxu0 }
 0x1ec   : > { %v1613_v10 = vadd.f32 %v1612_v49, %v1611_v46  ;;  %v1660_v32 = vadd.f32 %v1659_v18, %v1658_v44 }
 0x1ee   : > { %v819_v33 = vadd.f32 %v1657_v42, %v1613_v10  ;;  %v1614_v16 = vpop.f32.mrb[8].mxu1  ;;  %v1661_v39 = vpop.f32.mrb[6].mxu0  ;;  %v2046_v10 = vpack.c.bf16 %v1032_v8, %v1031_v36 }
 0x1ef   : > { %v1615_v24 = vpop.f32.mrb[9].mxu1  ;;  %v1662_v48 = vpop.f32.mrb[7].mxu0 }
 0x1f0   : > { %v1616_v47 = vadd.f32 %v1615_v24, %v1614_v16  ;;  %v1663_v52 = vadd.f32 %v1662_v48, %v1661_v39 }
 0x1f2   : > { %v824_v50 = vadd.f32 %v1660_v32, %v1616_v47  ;;  %v1617_v51 = vpop.f32.mrb[10].mxu1  ;;  %v1033_v32 = vld [vmem:[%s2923_s6 + $0x20] sm:$0xff] }
 0x1f3   : > { %v1618_v54 = vpop.f32.mrb[11].mxu1 }
 0x1f4   : > { %v1619_v55 = vadd.f32 %v1618_v54, %v1617_v51  ;;  %v1036_v54 = vld [vmem:[%s2923_s6 + $0x38] sm:$0xff] }
 0x1f6   : > { %v829_v56 = vadd.f32 %v1663_v52, %v1619_v55  ;;  %v1035_v52 = vld [vmem:[%s2923_s6 + $0x30] sm:$0xff]  ;;  %v1037_v55 = vld [vmem:[%s2923_s6 + $0x40] sm:$0xff] }
 0x206   : > { %v1696_v57 = vpop.f32.mrb[12].mxu1 }
 0x207   : > { %v1697_v59 = vpop.f32.mrb[13].mxu1 }
 0x208   : > { %v1698_v60 = vadd.f32 %v1697_v59, %v1696_v57  ;;  %v1038_v59 = vld [vmem:[%s2923_s6 + $0x48] sm:$0xff] }
 0x20a   : > { %v985_v62 = vadd.f32 %v1698_v60, %v814_v43  ;;  %v1699_v63 = vpop.f32.mrb[14].mxu1 }
 0x20b   : > { %v1700_v0 = vpop.f32.mrb[15].mxu1 }
 0x20c   : > { %v996_v3 = vadd.f32 %v1537_v61, %v985_v62  ;;  %v1701_v2 = vadd.f32 %v1700_v0, %v1699_v63  ;;  %v2058_v0 = vpack.c.bf16 %v1038_v59, %v1037_v55 }
 0x20e   : > { %v1000_v4 = vmax.f32 %v996_v3, 0.0  ;;  %v986_v45 = vadd.f32 %v1701_v2, %v819_v33  ;;  %v1702_v5 = vpop.f32.mrb[16].mxu1  ;;  %v1034_v33 = vld [vmem:[%s2923_s6 + $0x28] sm:$0xff]  ;;  %v1039_v2 = vld [vmem:[%s2923_s6 + $0x50] sm:$0xff] }
 0x20f   : > { %v1703_v7 = vpop.f32.mrb[17].mxu1  ;;  %v2050_v48 = vpack.c.bf16 %v1034_v33, %v1033_v32 }
 0x210   : > { %v1008_v9 = vrot.slane %v1000_v4, 7  ;;  %v997_v11 = vadd.f32 %v1537_v61, %v986_v45  ;;  %v1704_v12 = vadd.f32 %v1703_v7, %v1702_v5  ;;  %v1040_v4 = vld [vmem:[%s2923_s6 + $0x58] sm:$0xff]  ;;  %v1041_v5 = vld [vmem:[%s2923_s6 + $0x60] sm:$0xff]  ;;  %v1042_v7 = vld [vmem:[%s2923_s6 + $0x68] sm:$0xff] }
 0x211   : > { %v2062_v45 = vpack.c.bf16 %v1040_v4, %v1039_v2 }
 0x212   : > { %1020 = vst [vmem:[#allocation2] sm:$0xfe] %v1008_v9  ;;  %v1001_v13 = vmax.f32 %v997_v11, 0.0  ;;  %v987_v15 = vadd.f32 %v1704_v12, %v824_v50  ;;  %v1705_v17 = vpop.f32.mrb[18].mxu1  ;;  %v1043_v11 = vld [vmem:[%s2923_s6 + $0x70] sm:$0xff]  ;;  %v1044_v12 = vld [vmem:[%s2923_s6 + $0x78] sm:$0xff] }
 0x213   : > { %v1706_v19 = vpop.f32.mrb[19].mxu1 }
 0x214   : > { %v1009_v20 = vrot.slane %v1001_v13, 7  ;;  %v998_v21 = vadd.f32 %v1537_v61, %v987_v15  ;;  %v1707_v23 = vadd.f32 %v1706_v19, %v1705_v17  ;;  %v2070_v13 = vpack.c.bf16 %v1044_v12, %v1043_v11 }
 0x216   : > { %v2820_v26 = vsel %vm505_vm1, %v1008_v9, %v1009_v20  ;;  %v1002_v27 = vmax.f32 %v998_v21, 0.0  ;;  %v988_v29 = vadd.f32 %v1707_v23, %v829_v56  ;;  %v2066_v9 = vpack.c.bf16 %v1042_v7, %v1041_v5 }
 0x217   : > { %v1070_v41 = vrot.slane %v2820_v26, 1  ;;  %v1274_v46 = vrot.slane %v2820_v26, 2 }
 0x218   : > { %v1011_v30 = vrot.slane %v1002_v27, 7  ;;  %v999_v34 = vadd.f32 %v1537_v61, %v988_v29 }
 0x219   : > { %v1045_v35 = vld [vmem:[#allocation2] sm:$0xfe] }
 0x21a   : > { %v2829_v37 = vsel %vm505_vm1, %v1009_v20, %v1011_v30  ;;  %v1003_v38 = vmax.f32 %v999_v34, 0.0  ;;  %v1069_v40 = vrot.slane %v1045_v35, 1  ;;  %v1025_v3 = vld [vmem:[#allocation2] sm:$0xff] }
 0x21b   : > { %v1072_v42 = vrot.slane %v2829_v37, 1  ;;  %v1276_v43 = vrot.slane %v2829_v37, 2  ;;  %v1252_v15 = vld [vmem:[#allocation2] sm:$0xfc] }
 0x21c   : > { %v1013_v44 = vrot.slane %v1003_v38, 7  ;;  %v1071_v49 = vsel %vm635_vm2, %v1069_v40, %v1070_v41  ;;  %v1273_v17 = vrot.slane %v1252_v15, 2 }
 0x21d   : > { %1800 = vmatprep.mubr.f32.mxu0 %v1071_v49  ;;  %v1073_v18 = vsel %vm635_vm2, %v1070_v41, %v1072_v42  ;;  %v2846_v16 = vsel %vm873_vm3, %v1274_v46, %v1276_v43 }
 0x21e   : > { %v1014_v24 = vsel %vm505_vm1, %v1011_v30, %v1013_v44  ;;  %1024 = vst [vmem:[#allocation2 + $0x40] sm:$0x1] %v1013_v44  ;;  %1801 = vmatmul.mubr.f32.vlgmr.msra.gmra.mrb[8].mxu0 %v1073_v18  ;;  %v1275_v19 = vsel %vm873_vm3, %v1273_v17, %v1274_v46 }
 0x21f   : > { %2045 = vmatpush3.bf16.msra.mxu0 %v2791_v25  ;;  %v1074_v47 = vrot.slane %v1014_v24, 1  ;;  %v1278_v39 = vrot.slane %v1014_v24, 2  ;;  %v2054_v25 = vpack.c.bf16 %v1036_v54, %v1035_v52 }
 0x220   : > { %2047 = vmatprep.subr.bf16.mxu0 %v2046_v10 }
 0x221   : > { %v1075_v50 = vsel %vm635_vm2, %v1072_v42, %v1074_v47  ;;  %v1279_v51 = vsel %vm873_vm3, %v1276_v43, %v1278_v39 }
 0x222   : > { %1803 = vmatprep.mubr.f32.mxu0 %v1075_v50  ;;  %1879 = vmatprep.mubr.f32.mxu1 %v1279_v51 }
 0x223   : > { %2049 = vmatpush3.bf16.msra.mxu0 %v2046_v10 }
 0x224   : > { %2051 = vmatprep.subr.bf16.mxu0 %v2050_v48 }
 0x225   : > { %v1046_v56 = vld [vmem:[#allocation2 + $0x40] sm:$0x1] }
 0x226   : > { %v1253_v57 = vld [vmem:[#allocation2 + $0x40] sm:$0x3]  ;;  %v1076_v60 = vrot.slane %v1046_v56, 1 }
 0x227   : > { %v1280_v61 = vrot.slane %v1253_v57, 2  ;;  %2053 = vmatpush3.bf16.msra.mxu0 %v2050_v48 }
 0x228   : > { %v1077_v62 = vsel %vm635_vm2, %v1074_v47, %v1076_v60  ;;  %2055 = vmatprep.subr.bf16.mxu0 %v2054_v25 }
 0x229   : > { %v1281_v63 = vsel %vm873_vm3, %v1278_v39, %v1280_v61  ;;  %1804 = vmatmul.mubr.f32.gmra.mrb[10].mxu0 %v1077_v62 }
 0x22a   : > { %1880 = vmatmul.mubr.f32.vlgmr.msra.gmra.mrb[20].mxu1 %v1281_v63  ;;  %1838 = vmatprep.mubr.f32.mxu0 %v1025_v3 }
 0x22b   : > { %2057 = vmatpush3.bf16.msra.mxu0 %v2054_v25 }
 0x22c   : > { %2059 = vmatprep.subr.bf16.mxu0 %v2058_v0 }
 0x22f   : > { %2061 = vmatpush3.bf16.msra.mxu0 %v2058_v0 }
 0x230   : > { %2063 = vmatprep.subr.bf16.mxu0 %v2062_v45 }
 0x233   : > { %2065 = vmatpush3.bf16.msra.mxu0 %v2062_v45 }
 0x234   : > { %2067 = vmatprep.subr.bf16.mxu0 %v2066_v9 }
 0x237   : > { %2069 = vmatpush3.bf16.msra.mxu0 %v2066_v9 }
 0x238   : > { %2071 = vmatprep.subr.bf16.mxu0 %v2070_v13 }
 0x23b   : > { %2073 = vmatpush3.bf16.msra.mxu0 %v2070_v13 }
 0x23c   : > { %2075 = vmatprep.subr.bf16.mxu0 %v2706_v53 }
 0x23e   : > { %1839 = vmatmul.mubr.f32.vlgmr.msra.gmra.mrb[8].mxu0 %v2820_v26 }
 0x23f   : > { %1841 = vmatprep.mubr.f32.mxu0 %v2829_v37  ;;  %2077 = vmatpush3.bf16.msra.mxu0 %v2706_v53 }
 0x240   : > { %2079 = vmatprep.subr.bf16.mxu0 %v2719_v58 }
 0x242   : > { %1842 = vmatmul.mubr.f32.gmra.mrb[10].mxu0 %v1014_v24 }
 0x243   : > { %2081 = vmatpush3.bf16.msra.mxu0 %v2719_v58  ;;  %1876 = vmatprep.mubr.f32.mxu0 %v1275_v19 }
 0x244   : > { %2083 = vmatprep.subr.bf16.mxu0 %v2738_v1 }
 0x247   : > { %2085 = vmatpush3.bf16.msra.mxu0 %v2738_v1 }
 0x248   : > { %2087 = vmatprep.subr.bf16.mxu0 %v2754_v6 }
 0x24b   : > { %2089 = vmatpush3.bf16.msra.mxu0 %v2754_v6  ;;  %v1570_v6 = vld [vmem:[%s2924_s7] ss:$0 sm:$0xff] }
 0x24c   : > { %2091 = vmatprep.subr.bf16.mxu0 %v2770_v14 }
 0x24f   : > { %2093 = vmatpush3.bf16.msra.mxu0 %v2770_v14 }
 0x250   : > { %2095 = vmatprep.subr.bf16.mxu0 %v2786_v22 }
 0x253   : > { %2097 = vmatpush3.bf16.msra.mxu0 %v2786_v22 }
 0x254   : > { %2099 = vmatprep.subr.bf16.mxu0 %v2802_v28 }
 0x257   : > { %2101 = vmatpush3.bf16.msra.mxu0 %v2802_v28 }
 0x258   : > { %2103 = vmatprep.subr.bf16.mxu0 %v2810_v31 }
 0x25b   : > { %2105 = vmatpush3.bf16.msra.mxu0 %v2810_v31 }
 0x25e   : > { %1877 = vmatmul.mubr.f32.vlgmr.msra.gmra.mrb[8].mxu0 %v2846_v16 }
 0x2fd   : > { %v1881_v53 = vpop.f32.mrb[20].mxu1 }
 0x2fe   : > { %v1362_v58 = vpop.f32.mrb[21].mxu1 }
 0x315   : > { %v1843_v1 = vpop.f32.mrb[10].mxu0 }
 0x316   : > { %v2122_v14 = vadd.f32 %v1881_v53, %v1843_v1  ;;  %v1243_v20 = vpop.f32.mrb[11].mxu0 }
 0x317   : > { %v2123_v22 = vadd.f32 %v1362_v58, %v1243_v20 }
 0x318   : > { %v1385_v21 = vadd.f32 %v2122_v14, %v1570_v6 }
 0x319   : > { %v1384_v28 = vadd.f32 %v2123_v22, %v1570_v6 }
 0x31a   : > { %v1389_v31 = vmax.f32 %v1385_v21, 0.0 }
 0x31b   : > { %v1388_v23 = vmax.f32 %v1384_v28, 0.0 }
 0x31c   : > { %1393 = vst [vmem:[%s325_s13 + $0x18] sm:$0xff] %v1389_v31 }
 0x31d   : > { %1392 = vst [vmem:[%s325_s13 + $0x10] sm:$0xff] %v1388_v23 }
 0x331   : > { %v1878_v26 = vpop.f32.mrb[8].mxu0 }
 0x332   : > { %v1383_v27 = vadd.f32 %v1878_v26, %v1570_v6  ;;  %v1352_v29 = vpop.f32.mrb[9].mxu0 }
 0x333   : > { %v1382_v30 = vadd.f32 %v1570_v6, %v1352_v29 }
 0x334   : > { %v1387_v34 = vmax.f32 %v1383_v27, 0.0 }
 0x335   : > { %v1386_v35 = vmax.f32 %v1382_v30, 0.0 }
 0x336   : > { %1391 = vst [vmem:[%s325_s13 + $0x8] sm:$0xff] %v1387_v34 }
 0x337   : > { %1390 = vst [vmem:[%s325_s13] sm:$0xff] %v1386_v35 }
 0x338 PF: > { %s18_s27 = sadd.s32 1, %s2146_s27  }
 0x339   : > { %p15_p4 = scmp.ge.s32.totalorder %s18_s27, 4  }
 0x33b   :  { %17 = sbr.rel (!%p15_p4) target bundleno = 1 (0x1), region = 90 }

</bundles_post_ra>
